<compile_context>
chip_gen: v5e
topology: v5e:2x2
jax: 0.10.0
libtpu: 0.0.40
codegen_flags: <defaults>
</compile_context>

<pallas_src>
import functools

import jax
import jax.numpy as jnp
from jax.experimental import pallas as pl
from jax.experimental.pallas import tpu as pltpu


def _round_up(x, m):
    return ((x + m - 1) // m) * m


def _round_down(x, m):
    return (x // m) * m


def _auto_num_partials():
    # Only v7x-class chips have 2 TensorCores per chip; on single-TC parts an extra
    # partials axis is pure grid overhead (review: v5e/v6e -> 1).
    try:
        kind = jax.devices()[0].device_kind.lower()
    except Exception:
        return 1
    return 2 if ("v7" in kind or "7x" in kind) else 1


def _ganloss_kernel(prob_ref, tw_ref, out_ref, acc_ref, *, p):
    # grid = (num_partials [core-parallel on v7x], tiles_per_partial [reduction])
    step = pl.program_id(1)

    @pl.when(step == 0)
    def _init():
        acc_ref[...] = jnp.zeros_like(acc_ref)
        out_ref[...] = jnp.zeros_like(out_ref)

    prob = prob_ref[...].astype(jnp.float32)   # (tg, cp) upcast in-register (bf16 ok)
    tw = tw_ref[...]                           # (tg, 2p) f32: [:, :p]=packed tgt col, [:, p:]=weight
    tg, cp = prob.shape

    col = jax.lax.broadcasted_iota(jnp.int32, (tg, cp), 1)

    # "Selected weight" slab: (1 - reward + 1e-6) at the one-hot lane, 0 elsewhere.
    # P = 128 // C is a tiny static loop.  (A v7x-only option is to build both slabs
    # with one (tg,p)x(p,cp) block-diagonal MXU expand to cut VALU ops ~2x.)
    sel_w = jnp.zeros((tg, cp), jnp.float32)
    for r in range(p):
        tr = tw[:, r:r + 1].astype(jnp.int32)  # exact: targets are small ints stored in f32
        wr = tw[:, p + r:p + r + 1]
        sel_w = jnp.where(col == tr, wr, sel_w)

    # Pure-VPU accumulation into the resident per-lane f32 scratch; no per-step
    # cross-lane reduce / scalar store.
    acc_ref[...] += prob * sel_w

    @pl.when(step == pl.num_programs(1) - 1)
    def _finalize():
        out_ref[...] += jnp.sum(acc_ref[...])


@functools.partial(jax.jit, static_argnames=("num_partials",))
def gan_loss(prob, target, reward, *, num_partials=None):
    """prob: (N, C) float, target: (N,) int, reward: (N,) float -> scalar f32 loss."""
    n, c = prob.shape
    target = target.reshape(-1)
    reward = reward.reshape(-1)

    if num_partials is None:
        num_partials = _auto_num_partials()

    itemsize = jnp.dtype(prob.dtype).itemsize
    sub_mult = {4: 8, 2: 16, 1: 32}.get(itemsize, 8)   # dtype-aware sublane tile

    # Lane-dense packing: fold P consecutive rows into one 128-lane row, but ONLY when
    # the reshape is a free row-major regroup (no jnp.pad copy of prob, review #2).
    # NOTE: when C < 128 and 128 % C != 0 (or N % P != 0) we fall back to P=1; the
    # prob tiles are then lane-sparse but still correct and copy-free.
    p = 128 // c if (c < 128 and 128 % c == 0 and n % (128 // c) == 0) else 1
    cp = c * p
    np_rows = n // p                                    # exact by construction of p

    # Per-packed-row VMEM bytes per pipeline buffer (side tile is lane-padded to 128).
    prob_row_vmem = _round_up(cp, 128) * itemsize
    tw_row_vmem = _round_up(2 * p, 128) * 4
    row_vmem = prob_row_vmem + tw_row_vmem

    per_buffer_budget = 5 * 1024 * 1024                 # ~10 MiB of double-buffered inputs
    tg = max(sub_mult, min(8192, _round_down(per_buffer_budget // row_vmem, sub_mult)))

    # Combined (packed target column | weight) side array, f32, tiny vs prob.
    sub = jnp.arange(n, dtype=jnp.int32) % p
    tgt_col = target.astype(jnp.int32) + sub * c
    wgt = 1.0 - reward.astype(jnp.float32) + 1e-06

    prob_packed = prob.reshape(np_rows, cp)             # free bitcast (row-major regroup)
    tw = jnp.concatenate(
        [tgt_col.astype(jnp.float32).reshape(np_rows, p), wgt.reshape(np_rows, p)],
        axis=1)                                         # (np_rows, 2p)

    t_full = np_rows // tg
    if t_full == 0:
        # Everything fits in a single small tile: pad the few missing rows (cheap here;
        # target sentinel -1 never matches a lane -> padded rows contribute exactly 0).
        num_partials = 1
        tiles_per_partial = 1
        tg = _round_up(max(np_rows, 1), sub_mult)
        pad_rows = tg - np_rows
        if pad_rows:
            prob_packed = jnp.pad(prob_packed, ((0, pad_rows), (0, 0)))
            tw = jnp.pad(tw, ((0, pad_rows), (0, 0)), constant_values=-1.0)
        n_main = n
    else:
        num_partials = max(1, min(num_partials, t_full))
        t_used = _round_down(t_full, num_partials)
        tiles_per_partial = t_used // num_partials
        n_main = t_used * tg * p
        # Ragged tail (< one grid sweep of rows) is handled by a tiny pure-JAX gather
        # below instead of jnp.pad-copying the whole prob array.

    row_map = lambda s, i: (s * tiles_per_partial + i, 0)

    acc_bytes = tg * _round_up(cp, 128) * 4
    vmem_limit = int(min(32 * 1024 * 1024,
                         max(16 * 1024 * 1024,
                             2 * tg * row_vmem + acc_bytes + 4 * 1024 * 1024)))

    # Real 2-TC sharding on v7x; plain "parallel" elsewhere (single core).
    axis0 = getattr(pltpu, "CORE_PARALLEL", "parallel") if num_partials > 1 else "parallel"

    n_main_packed = n_main // p
    cost = pl.CostEstimate(
        flops=int(n_main_packed * cp * (2 * p + 3)),
        transcendentals=0,
        bytes_accessed=int(n_main_packed * (cp * itemsize + 2 * p * 4) + num_partials * 4),
    )

    partials = pl.pallas_call(
        functools.partial(_ganloss_kernel, p=p),
        out_shape=jax.ShapeDtypeStruct((num_partials, 1, 1), jnp.float32),
        grid=(num_partials, tiles_per_partial),
        in_specs=[
            pl.BlockSpec((tg, cp), row_map),
            pl.BlockSpec((tg, 2 * p), row_map),
        ],
        out_specs=pl.BlockSpec((1, 1, 1), lambda s, i: (s, 0, 0)),
        scratch_shapes=[pltpu.VMEM((tg, cp), jnp.float32)],
        compiler_params=pltpu.CompilerParams(
            dimension_semantics=(axis0, "arbitrary"),
            vmem_limit_bytes=vmem_limit,
        ),
        cost_estimate=cost,
    )(prob_packed, tw)

    total = jnp.sum(partials)

    if n_main < n:
        # Pure-JAX ragged tail: touches only the last (< one grid sweep) rows of prob.
        p_tail = jnp.take_along_axis(
            prob[n_main:].astype(jnp.float32),
            target[n_main:].astype(jnp.int32)[:, None], axis=1)[:, 0]
        total = total + jnp.sum(p_tail * wgt[n_main:])

    # Divide by the GLOBAL N (padded / skipped rows contributed exactly 0).
    return -total / jnp.float32(n)


def _reference(prob, target, reward):
    n = prob.shape[0]
    sel = prob[jnp.arange(n), target]
    return -jnp.mean(sel * (1.0 - reward.astype(jnp.float32) + 1e-06))


if __name__ == "__main__":
    key = jax.random.PRNGKey(0)
    k1, k2, k3, k4, k5, k6 = jax.random.split(key, 6)

    # --- Test A: small shapes (batch=8, classes=32) -> packed single-tile path ---
    N, C = 8, 32
    prob = jax.nn.softmax(jax.random.normal(k1, (N, C), dtype=jnp.float32), axis=-1)
    target = jax.random.randint(k2, (N,), 0, C, dtype=jnp.int32)
    reward = jax.random.uniform(k3, (N,), dtype=jnp.float32)

    loss = gan_loss(prob, target, reward)
    jax.block_until_ready(loss)
    ref = _reference(prob, target, reward)
    assert jnp.allclose(loss, ref, atol=1e-6, rtol=1e-5), (loss, ref)

    # --- Test B: larger, tile-unaligned N -> multi-tile grid + pure-JAX tail path ---
    NB = 44000
    prob_b = jax.nn.softmax(jax.random.normal(k4, (NB, C), dtype=jnp.float32), axis=-1)
    target_b = jax.random.randint(k5, (NB,), 0, C, dtype=jnp.int32)
    reward_b = jax.random.uniform(k6, (NB,), dtype=jnp.float32)

    loss_b = gan_loss(prob_b, target_b, reward_b)
    jax.block_until_ready(loss_b)
    ref_b = _reference(prob_b, target_b, reward_b)
    assert jnp.allclose(loss_b, ref_b, atol=1e-6, rtol=2e-4), (loss_b, ref_b)

    print("KERNEL_OK")
</pallas_src>

<mosaic_0001>
module attributes {stable_mosaic.version = 11 : i64} {
  func.func @_ganloss_kernel(%arg0: i32, %arg1: i32, %arg2: memref<8x128xf32, #tpu.memory_space<vmem>>, %arg3: memref<8x8xf32, #tpu.memory_space<vmem>>, %arg4: memref<1x1x1xf32, #tpu.memory_space<vmem>>, %arg5: memref<8x128xf32, #tpu.memory_space<vmem>>) attributes {dimension_semantics = [#tpu.dimension_semantics<parallel>, #tpu.dimension_semantics<arbitrary>], iteration_bounds = array<i64: 1, 1>, scalar_prefetch = 0 : i64, scratch_operands = 1 : i64, tpu.core_type = #tpu.core_type<tc>, window_params = [{transform_indices = @transform_0, window_bounds = array<i64: 8, 128>}, {transform_indices = @transform_1, window_bounds = array<i64: 8, 8>}, {transform_indices = @transform_2, window_bounds = array<i64: 1, 1, 1>}]} {
    %c0_i32 = arith.constant 0 : i32
    %0 = arith.cmpi eq, %arg1, %c0_i32 : i32
    %1 = arith.extui %0 : i1 to i32
    %c0_i32_0 = arith.constant 0 : i32
    %2 = arith.cmpi ne, %1, %c0_i32_0 : i32
    scf.if %2 {
      %cst_10 = arith.constant 0.000000e+00 : f32
      %46 = vector.broadcast %cst_10 : f32 to vector<8x128xf32>
      %c0_11 = arith.constant 0 : index
      %c0_12 = arith.constant 0 : index
      %47 = vector.load %arg5[%c0_11, %c0_12] : memref<8x128xf32, #tpu.memory_space<vmem>>, vector<8x128xf32>
      tpu.vector_store %arg5[%c0_11, %c0_12], %46 {strides = array<i32>} : memref<8x128xf32, #tpu.memory_space<vmem>>, vector<8x128xf32>,
      %cst_13 = arith.constant 0.000000e+00 : f32
      %48 = vector.broadcast %cst_13 : f32 to vector<1x1x1xf32>
      %c0_14 = arith.constant 0 : index
      %c0_15 = arith.constant 0 : index
      %c0_16 = arith.constant 0 : index
      %49 = vector.load %arg4[%c0_14, %c0_15, %c0_16] : memref<1x1x1xf32, #tpu.memory_space<vmem>>, vector<1x1x1xf32>
      tpu.vector_store %arg4[%c0_14, %c0_15, %c0_16], %48 {strides = array<i32>} : memref<1x1x1xf32, #tpu.memory_space<vmem>>, vector<1x1x1xf32>,
    } else {
    }
    %c0 = arith.constant 0 : index
    %c0_1 = arith.constant 0 : index
    %3 = vector.load %arg2[%c0, %c0_1] : memref<8x128xf32, #tpu.memory_space<vmem>>, vector<8x128xf32>
    %c0_2 = arith.constant 0 : index
    %c0_3 = arith.constant 0 : index
    %4 = vector.load %arg3[%c0_2, %c0_3] : memref<8x8xf32, #tpu.memory_space<vmem>>, vector<8x8xf32>
    %5 = tpu.iota {dimensions = array<i32: 1>} : vector<8x128xi32>
    %cst = arith.constant 0.000000e+00 : f32
    %6 = vector.broadcast %cst : f32 to vector<8x128xf32>
    %7 = vector.extract_strided_slice %4 {offsets = [0, 0], sizes = [8, 1], strides = [1, 1]} : vector<8x8xf32> to vector<8x1xf32>
    %8 = arith.fptosi %7 : vector<8x1xf32> to vector<8x1xi32>
    %9 = vector.extract_strided_slice %4 {offsets = [0, 4], sizes = [8, 1], strides = [1, 1]} : vector<8x8xf32> to vector<8x1xf32>
    %10 = vector.broadcast %8 : vector<8x1xi32> to vector<8x128xi32>
    %11 = arith.cmpi eq, %5, %10 : vector<8x128xi32>
    %12 = vector.shape_cast %9 : vector<8x1xf32> to vector<8x1xf32>
    %13 = vector.broadcast %12 : vector<8x1xf32> to vector<8x128xf32>
    %14 = arith.select %11, %13, %6 : vector<8x128xi1>, vector<8x128xf32>
    %15 = vector.extract_strided_slice %4 {offsets = [0, 1], sizes = [8, 1], strides = [1, 1]} : vector<8x8xf32> to vector<8x1xf32>
    %16 = arith.fptosi %15 : vector<8x1xf32> to vector<8x1xi32>
    %17 = vector.extract_strided_slice %4 {offsets = [0, 5], sizes = [8, 1], strides = [1, 1]} : vector<8x8xf32> to vector<8x1xf32>
    %18 = vector.broadcast %16 : vector<8x1xi32> to vector<8x128xi32>
    %19 = arith.cmpi eq, %5, %18 : vector<8x128xi32>
    %20 = vector.shape_cast %17 : vector<8x1xf32> to vector<8x1xf32>
    %21 = vector.broadcast %20 : vector<8x1xf32> to vector<8x128xf32>
    %22 = arith.select %19, %21, %14 : vector<8x128xi1>, vector<8x128xf32>
    %23 = vector.extract_strided_slice %4 {offsets = [0, 2], sizes = [8, 1], strides = [1, 1]} : vector<8x8xf32> to vector<8x1xf32>
    %24 = arith.fptosi %23 : vector<8x1xf32> to vector<8x1xi32>
    %25 = vector.extract_strided_slice %4 {offsets = [0, 6], sizes = [8, 1], strides = [1, 1]} : vector<8x8xf32> to vector<8x1xf32>
    %26 = vector.broadcast %24 : vector<8x1xi32> to vector<8x128xi32>
    %27 = arith.cmpi eq, %5, %26 : vector<8x128xi32>
    %28 = vector.shape_cast %25 : vector<8x1xf32> to vector<8x1xf32>
    %29 = vector.broadcast %28 : vector<8x1xf32> to vector<8x128xf32>
    %30 = arith.select %27, %29, %22 : vector<8x128xi1>, vector<8x128xf32>
    %31 = vector.extract_strided_slice %4 {offsets = [0, 3], sizes = [8, 1], strides = [1, 1]} : vector<8x8xf32> to vector<8x1xf32>
    %32 = arith.fptosi %31 : vector<8x1xf32> to vector<8x1xi32>
    %33 = vector.extract_strided_slice %4 {offsets = [0, 7], sizes = [8, 1], strides = [1, 1]} : vector<8x8xf32> to vector<8x1xf32>
    %34 = vector.broadcast %32 : vector<8x1xi32> to vector<8x128xi32>
    %35 = arith.cmpi eq, %5, %34 : vector<8x128xi32>
    %36 = vector.shape_cast %33 : vector<8x1xf32> to vector<8x1xf32>
    %37 = vector.broadcast %36 : vector<8x1xf32> to vector<8x128xf32>
    %38 = arith.select %35, %37, %30 : vector<8x128xi1>, vector<8x128xf32>
    %c0_4 = arith.constant 0 : index
    %c0_5 = arith.constant 0 : index
    %39 = vector.load %arg5[%c0_4, %c0_5] : memref<8x128xf32, #tpu.memory_space<vmem>>, vector<8x128xf32>
    %40 = arith.mulf %3, %38 : vector<8x128xf32>
    %41 = arith.addf %39, %40 : vector<8x128xf32>
    %c0_6 = arith.constant 0 : index
    %c0_7 = arith.constant 0 : index
    %42 = vector.load %arg5[%c0_6, %c0_7] : memref<8x128xf32, #tpu.memory_space<vmem>>, vector<8x128xf32>
    tpu.vector_store %arg5[%c0_6, %c0_7], %41 {strides = array<i32>} : memref<8x128xf32, #tpu.memory_space<vmem>>, vector<8x128xf32>,
    %c0_i32_8 = arith.constant 0 : i32
    %43 = arith.cmpi eq, %arg1, %c0_i32_8 : i32
    %44 = arith.extui %43 : i1 to i32
    %c0_i32_9 = arith.constant 0 : i32
    %45 = arith.cmpi ne, %44, %c0_i32_9 : i32
    scf.if %45 {
      %c0_10 = arith.constant 0 : index
      %c0_11 = arith.constant 0 : index
      %c0_12 = arith.constant 0 : index
      %46 = vector.load %arg4[%c0_10, %c0_11, %c0_12] : memref<1x1x1xf32, #tpu.memory_space<vmem>>, vector<1x1x1xf32>
      %c0_13 = arith.constant 0 : index
      %c0_14 = arith.constant 0 : index
      %47 = vector.load %arg5[%c0_13, %c0_14] : memref<8x128xf32, #tpu.memory_space<vmem>>, vector<8x128xf32>
      %48 = vector.shape_cast %47 : vector<8x128xf32> to vector<1x8x128xf32>
      %cst_15 = arith.constant dense<0.000000e+00> : vector<1xf32>
      %49 = vector.multi_reduction <add>, %48, %cst_15 [1, 2] : vector<1x8x128xf32> to vector<1xf32>
      %50 = vector.shape_cast %49 : vector<1xf32> to vector<1x1x1xf32>
      %51 = vector.extract %50[0, 0, 0] : f32 from vector<1x1x1xf32>
      %52 = vector.broadcast %51 : f32 to vector<1x1x1xf32>
      %53 = arith.addf %46, %52 : vector<1x1x1xf32>
      %c0_16 = arith.constant 0 : index
      %c0_17 = arith.constant 0 : index
      %c0_18 = arith.constant 0 : index
      %54 = vector.load %arg4[%c0_16, %c0_17, %c0_18] : memref<1x1x1xf32, #tpu.memory_space<vmem>>, vector<1x1x1xf32>
      tpu.vector_store %arg4[%c0_16, %c0_17, %c0_18], %53 {strides = array<i32>} : memref<1x1x1xf32, #tpu.memory_space<vmem>>, vector<1x1x1xf32>,
    } else {
    }
    return
  }
  func.func @transform_0(%arg0: i32, %arg1: i32) -> (i32, i32) {
    %c1_i32 = arith.constant 1 : i32
    %0 = arith.muli %arg0, %c1_i32 : i32
    %1 = arith.addi %0, %arg1 : i32
    %c0_i32 = arith.constant 0 : i32
    %c0_i32_0 = arith.constant 0 : i32
    return %1, %c0_i32 : i32, i32
  }
  func.func @transform_1(%arg0: i32, %arg1: i32) -> (i32, i32) {
    %c1_i32 = arith.constant 1 : i32
    %0 = arith.muli %arg0, %c1_i32 : i32
    %1 = arith.addi %0, %arg1 : i32
    %c0_i32 = arith.constant 0 : i32
    %c0_i32_0 = arith.constant 0 : i32
    return %1, %c0_i32 : i32, i32
  }
  func.func @transform_2(%arg0: i32, %arg1: i32) -> (i32, i32, i32) {
    %c0_i32 = arith.constant 0 : i32
    %c0_i32_0 = arith.constant 0 : i32
    %c0_i32_1 = arith.constant 0 : i32
    return %arg0, %c0_i32, %c0_i32_0 : i32, i32, i32
  }
}

</mosaic_0001>

<bundles_post_ra>
// kernel: gan_loss.1
= control target key start
LH: loop header
LB: loop body
LE: loop exit
PB: predicated region body
PF: predicated region fallthrough
CT: control target
= control target key end

     0   :  { %v197_v1 = vmov 1   ;;  %v198_v2 = vmov 0   ;;  %s233_s0 = inlined_call_operand.vmem [shape: f32[8,128], index: 0, kind: input, shape index: {}]   ;;  %s234_s1 = inlined_call_operand.vmem [shape: f32[8,8], index: 1, kind: input, shape index: {}]   ;;  %s235_s2 = inlined_call_operand.hbm [shape: f32[1,1,1], index: 2, kind: output, shape index: {}]  }
   0x1   :  { %v54_v0 = vld [vmem:[%s234_s1] sm:$0xff]  ;;  %164 = vset.pattern.permute.xlu1 %v197_v1  ;;  %162 = vset.pattern.permute.xlu0 %v198_v2 }
   0x2   :  { %vm145_vm0 = vcmp.lt.s32.totalorder %v54_v0, 0  ;;  %v146_v3 = vceil.f32 %v54_v0  ;;  %v147_v4 = vfloor.f32 %v54_v0 }
   0x3   :  { %7 = vsyncpa [#allocation4], 0  ;;  %v199_v6 = vmov 2   ;;  %v200_v8 = vmov 5   ;;  %v201_v9 = vmov 4   ;;  %v202_v10 = vmov 6  }
   0x4   :  { %v148_v5 = vsel %vm145_vm0, %v146_v3, %v147_v4  ;;  %166 = vset.pattern.permute.xlu2 %v199_v6  ;;  %v203_v11 = vmov 3   ;;  %v204_v12 = vmov 7   ;;  %v55_v16 = vlaneseq  ;;  %v53_v25 = vld [vmem:[%s233_s0] sm:$0xff]  ;;  %s206_s12 = smov [#allocation3]   ;;  %s124_s15 = sshll.u32 %s235_s2, 4  ;;  %s125_s15 = int_to_ptr.hbm [resolvable:$true] %s124_s15 }
   0x5   :  { %v149_v7 = vcvt.f32.s32 %v148_v5  ;;  %vm51_vm5 = vcmask 0   ;;  %v205_v29 = vmov 0.0   ;;  %s122_s0 = sshll.u32 %s206_s12, 4  ;;  %s123_s0 = int_to_ptr.vmem [resolvable:$true] %s122_s0 }
   0x6   :  { %v56_v18 = vand.u32 127, %v55_v16  ;;  %52 = vst.msk [vmem:[#allocation3] sm:$0x1] %vm51_vm5, %v205_v29 }
   0x7   :  { %69 = vperm.xlu1 %164, %v149_v7   ;;  %59 = vperm.xlu0 %162, %v149_v7  }
   0x8   :  { %78 = vperm.xlu2 %166, %v149_v7  }
   0xd   :  { %v102_v37 = vld [vmem:[#allocation3] sm:$0x1] }
   0xf   :  { %165 = vset.pattern.permute.xlu1 %v200_v8  ;;  %163 = vset.pattern.permute.xlu0 %v201_v9 }
  0x10   :  { %73 = vperm.xlu1 %165, %v54_v0   ;;  %64 = vperm.xlu0 %163, %v54_v0  }
  0x11   :  { %167 = vset.pattern.permute.xlu2 %v202_v10 }
  0x12   :  { %82 = vperm.xlu2 %167, %v54_v0  }
  0x18   :  { %168 = vset.pattern.permute.xlu1 %v203_v11  ;;  %170 = vset.pattern.permute.xlu0 %v204_v12 }
  0x19   :  { %87 = vperm.xlu1 %168, %v149_v7  }
  0x1a   :  { %169 = vset.pattern.permute.xlu2 %v204_v12 }
  0x1b   :  { %91 = vperm.xlu2 %169, %v54_v0  }
  0x62   :  { %v79_v13 = vpop.permute.xlu2 %78 }
  0x63   :  { %vm80_vm3 = vcmp.eq.s32.totalorder %v56_v18, %v79_v13 }
  0x6c   :  { %v83_v17 = vpop.permute.xlu2 %82 }
  0x75   :  { %v92_v23 = vpop.permute.xlu2 %91 }
  0x79   :  { %v70_v14 = vpop.permute.xlu1 %69  ;;  %v60_v15 = vpop.permute.xlu0 %59 }
  0x7a   :  { %vm61_vm1 = vcmp.eq.s32.totalorder %v56_v18, %v60_v15  ;;  %vm71_vm2 = vcmp.eq.s32.totalorder %v56_v18, %v70_v14 }
  0x82   :  { %v74_v19 = vpop.permute.xlu1 %73  ;;  %v65_v20 = vpop.permute.xlu0 %64 }
  0x83   :  { %v67_v21 = vsel %vm61_vm1, %v65_v20, 0.0 }
  0x84   :  { %v76_v22 = vsel %vm71_vm2, %v74_v19, %v67_v21 }
  0x85   :  { %v85_v26 = vsel %vm80_vm3, %v83_v17, %v76_v22 }
  0x8b   :  { %v88_v24 = vpop.permute.xlu1 %87 }
  0x8c   :  { %vm89_vm4 = vcmp.eq.s32.totalorder %v56_v18, %v88_v24 }
  0x8d   :  { %v94_v27 = vsel %vm89_vm4, %v92_v23, %v85_v26 }
  0x8e   :  { %v96_v28 = vmul.f32 %v94_v27, %v53_v25 }
  0x90   :  { %104 = vadd.xlane.f32.xlu0 %v96_v28 }
 0x103   :  { %v105_v30 = vpop.xlane.xlu0 %104 }
 0x104   :  { %v106_v31 = vrot.slane %v105_v30, 4 }
 0x106   :  { %v107_v32 = vadd.f32 %v106_v31, %v105_v30 }
 0x108   :  { %v108_v33 = vrot.slane %v107_v32, 2 }
 0x10a   :  { %v109_v34 = vadd.f32 %v108_v33, %v107_v32 }
 0x10c   :  { %v110_v35 = vrot.slane %v109_v34, 1 }
 0x10e   :  { %v111_v36 = vadd.f32 %v110_v35, %v109_v34 }
 0x110   :  { %150 = vpush %v111_v36 }
 0x141   :  { %s151_s16 = spop %150 }
 0x142   :  { %v113_v38 = vstv %s151_s16 }
 0x143   :  { %v114_v39 = vadd.f32 %v113_v38, %v102_v37 }
 0x145   :  { %116 = vst.msk [vmem:[#allocation3] sm:$0x1] %vm51_vm5, %v114_v39 }
 0x146   :  { %127 = dma.vmem_to_hbm [thread:$0]  %s123_s0, 16, %s125_s15, [#allocation4]  }
 0x147   :  { %195 = dma.done.wait [#allocation4], 16  }
 0x148   :  { %196 = vsyncadd [#allocation4], 4294967280 }
 0x149   :  { %132 = vsyncpa [#allocation4], 1 }

</bundles_post_ra>
